<compile_context>
chip_gen: v6e
topology: v6e:2x2x1
jax: 0.10.0
libtpu: 0.0.40
codegen_flags: <defaults>
</compile_context>

<pallas_src>
import math

import jax
import jax.numpy as jnp
from jax.experimental import pallas as pl
from jax.experimental.pallas import tpu as pltpu


def _round_up(x, m):
    return ((x + m - 1) // m) * m


# ----------------------------------------------------------------------------
# Kernel factory: fused Depth-layer MLP on one batch tile.
#   refs: x_ref [TB, InWidth], w_i refs [K_i, N_i] (bf16, VMEM-resident),
#         o_ref [TB, OutWidth]
# ----------------------------------------------------------------------------
def _make_mlp_kernel(depth, g_hidden, g_last):
    def kernel(*refs):
        x_ref = refs[0]
        w_refs = refs[1:1 + depth]
        o_ref = refs[1 + depth]

        # bf16 operands for the MXU; this is a no-op when the caller already
        # feeds bf16 activations (the recommended path).
        a = x_ref[...].astype(jnp.bfloat16)
        act = a
        for i, w_ref in enumerate(w_refs):
            g = g_hidden if i < depth - 1 else g_last
            acc = jnp.dot(a, w_ref[...],
                          preferred_element_type=jnp.float32)   # MXU, f32 acc
            act = g(acc)                                        # f32 on EUP
            if i < depth - 1:
                # Keep intermediates bf16: it's the next dot's operand dtype
                # anyway, and it halves the vreg/VMEM footprint.
                a = act.astype(jnp.bfloat16)
        o_ref[...] = act.astype(o_ref.dtype)

    return kernel


# ----------------------------------------------------------------------------
# One-time parameter preparation (hoisted out of the forward path).
# PyTorch-layout weights [out, in] (f32) -> kernel layout [in, out] bf16.
# ----------------------------------------------------------------------------
def prepare_weights(weights_torch_layout):
    return [jnp.asarray(w.T, dtype=jnp.bfloat16) for w in weights_torch_layout]


# ----------------------------------------------------------------------------
# Forward wrapper: exactly one pallas_call per forward.
#   x_nchw:    [B, C, H, W]  (bf16 preferred; any float dtype accepted)
#   weights_t: list of Depth arrays [in_features, out_features], bf16
# ----------------------------------------------------------------------------
def fcf_forward(x_nchw, weights_t, *, g_hidden=jnp.tanh, g_last=jnp.tanh,
                batch_tile=2048, out_dtype=jnp.float32):
    B = x_nchw.shape[0]
    x_flat = x_nchw.reshape(B, -1)                      # nn.Flatten()
    in_width = x_flat.shape[1]
    out_width = weights_t[-1].shape[1]
    depth = len(weights_t)

    # Batch tile choice:
    #   * large (<= 2048) to amortize the ~0.35 us per-grid-step overhead,
    #   * >= 2 grid steps once B > 16 so ("parallel",) can shard the batch
    #     across both v7x TensorCores,
    #   * multiple of 16 (native bf16 sublane tile; also multiple of 8).
    if B <= 16:
        tb = B                                           # full-array block
    else:
        tb = min(batch_tile, _round_up(pl.cdiv(B, 2), 16))
    grid = (pl.cdiv(B, tb),)
    # NOTE: a partial final tile (B % tb != 0) is correct -- OOB input rows are
    # padded, tanh of padding is finite, and OOB output rows are masked.

    kernel = _make_mlp_kernel(depth, g_hidden, g_last)

    in_specs = [pl.BlockSpec((tb, in_width), lambda i: (i, 0))]
    # Weights: same block index every grid step -> resident in VMEM, DMA'd from
    # HBM once; Buffered(1) disables the pointless second pipeline buffer.
    for w in weights_t:
        try:
            spec = pl.BlockSpec(w.shape, lambda i: (0, 0),
                                pipeline_mode=pl.Buffered(1))
        except TypeError:  # very old BlockSpec without pipeline_mode kwarg
            spec = pl.BlockSpec(w.shape, lambda i: (0, 0))
        in_specs.append(spec)
    out_specs = pl.BlockSpec((tb, out_width), lambda i: (i, 0))
    # Output is ~64 B/row vs ~2 KiB/row of bf16 input: masked 16-lane stores
    # are nowhere near the critical path, so no lane padding.

    # Advisory cost estimate (mem-bound custom call).
    flops = 2 * B * sum(int(w.shape[0]) * int(w.shape[1]) for w in weights_t)
    transcendentals = B * sum(int(w.shape[1]) for w in weights_t)
    bytes_accessed = (B * in_width * x_flat.dtype.itemsize
                      + B * out_width * jnp.dtype(out_dtype).itemsize
                      + sum(int(w.size) * w.dtype.itemsize for w in weights_t))

    return pl.pallas_call(
        kernel,
        out_shape=jax.ShapeDtypeStruct((B, out_width), out_dtype),
        grid=grid,
        in_specs=in_specs,
        out_specs=out_specs,
        compiler_params=pltpu.CompilerParams(
            dimension_semantics=("parallel",),         # megacore on v7x
            vmem_limit_bytes=48 * 1024 * 1024),        # > v5e 16 MiB default,
                                                       # < v7x 64 MiB physical
        cost_estimate=pl.CostEstimate(
            flops=flops,
            transcendentals=transcendentals,
            bytes_accessed=bytes_accessed),
    )(x_flat, *weights_t)


# ----------------------------------------------------------------------------
# Deterministic parameter init (kaiming_uniform_ with tanh gain, PyTorch layout).
# ----------------------------------------------------------------------------
def kaiming_uniform_tanh(key, out_features, in_features):
    gain = 5.0 / 3.0                                    # tanh gain
    bound = gain * math.sqrt(3.0 / in_features)
    return jax.random.uniform(key, (out_features, in_features),
                              dtype=jnp.float32,
                              minval=-bound, maxval=bound)


# References -----------------------------------------------------------------
def reference_forward_f32(x_nchw, weights_torch_layout):
    """Module-faithful f32 reference (PyTorch semantics)."""
    a = x_nchw.reshape(x_nchw.shape[0], -1).astype(jnp.float32)
    for w in weights_torch_layout:
        a = jnp.tanh(a @ w.T)
    return a


def reference_forward_bf16path(x_nchw, weights_t):
    """Mirrors the kernel numerics (bf16 operands, f32 accumulation)."""
    a = x_nchw.reshape(x_nchw.shape[0], -1).astype(jnp.bfloat16)
    act = a
    for i, w in enumerate(weights_t):
        acc = jnp.dot(a, w, preferred_element_type=jnp.float32)
        act = jnp.tanh(acc)
        if i < len(weights_t) - 1:
            a = act.astype(jnp.bfloat16)
    return act


if __name__ == "__main__":
    # HyperParams implied by this instantiation:
    #   Depth = 3, InWidth = C*H*W = 4*16*16 = 1024,
    #   HiddenWidth = [32, 32], OutWidth = 16,
    #   gHidden = gLast = tanh, UseBias = False.
    B, C, H, W = 2, 4, 16, 16
    in_width = C * H * W
    hidden_widths = [32, 32]
    out_width = 16

    key = jax.random.PRNGKey(0)
    k_x, k_xl, k0, k1, k2 = jax.random.split(key, 5)

    # Data prep (outside the forward / jit path): feed the kernel bf16
    # activations so the dominant x HBM stream is half the bytes.
    x = jax.random.normal(k_x, (B, C, H, W),
                          dtype=jnp.float32).astype(jnp.bfloat16)

    weights_f32 = [
        kaiming_uniform_tanh(k0, hidden_widths[0], in_width),          # layer 0
        kaiming_uniform_tanh(k1, hidden_widths[1], hidden_widths[0]),  # layer 1
        kaiming_uniform_tanh(k2, out_width, hidden_widths[1]),         # layer 2
    ]
    # One-time prep (transpose + bf16) -- NOT in the forward path.
    weights_t = prepare_weights(weights_f32)

    fwd = jax.jit(lambda xx, *ws: fcf_forward(xx, list(ws)))

    # ---- small-batch check (B=2, single grid step, full-array tile) --------
    out = jax.block_until_ready(fwd(x, *weights_t))
    assert out.shape == (B, out_width), out.shape
    ref_exact = reference_forward_bf16path(x, weights_t)
    ref_f32 = reference_forward_f32(x, weights_f32)
    assert jnp.allclose(out, ref_exact, atol=1e-3, rtol=1e-3), \
        float(jnp.max(jnp.abs(out - ref_exact)))
    assert jnp.allclose(out, ref_f32, atol=5e-2, rtol=5e-2), \
        float(jnp.max(jnp.abs(out - ref_f32)))

    # ---- larger-batch check: multi-step grid (>= 2 steps -> both v7x cores)
    #      with a partial final tile (B % tb != 0) ---------------------------
    BL = 200
    x_large = jax.random.normal(k_xl, (BL, C, H, W),
                                dtype=jnp.float32).astype(jnp.bfloat16)
    out_large = jax.block_until_ready(fwd(x_large, *weights_t))
    ref_large = reference_forward_bf16path(x_large, weights_t)
    assert out_large.shape == (BL, out_width), out_large.shape
    assert jnp.allclose(out_large, ref_large, atol=1e-3, rtol=1e-3), \
        float(jnp.max(jnp.abs(out_large - ref_large)))

    # TODO(synk): UpdateParams / InitializeParams (Hebbian-style update rules)
    # are training-time methods, not part of forward, and are not implemented.
    print("KERNEL_OK")
</pallas_src>

<mosaic_0001>
module attributes {stable_mosaic.version = 11 : i64} {
  func.func @kernel(%arg0: i32, %arg1: memref<2x1024xbf16, #tpu.memory_space<vmem>>, %arg2: memref<1024x32xbf16, #tpu.memory_space<vmem>>, %arg3: memref<32x32xbf16, #tpu.memory_space<vmem>>, %arg4: memref<32x16xbf16, #tpu.memory_space<vmem>>, %arg5: memref<2x16xf32, #tpu.memory_space<vmem>>) attributes {dimension_semantics = [#tpu.dimension_semantics<parallel>], iteration_bounds = array<i64: 1>, scalar_prefetch = 0 : i64, scratch_operands = 0 : i64, tpu.core_type = #tpu.core_type<tc>, window_params = [{transform_indices = @transform_0, window_bounds = array<i64: 2, 1024>}, {pipeline_mode = #tpu.pipeline_mode<synchronous>, transform_indices = @transform_1, window_bounds = array<i64: 1024, 32>}, {pipeline_mode = #tpu.pipeline_mode<synchronous>, transform_indices = @transform_2, window_bounds = array<i64: 32, 32>}, {pipeline_mode = #tpu.pipeline_mode<synchronous>, transform_indices = @transform_3, window_bounds = array<i64: 32, 16>}, {transform_indices = @transform_4, window_bounds = array<i64: 2, 16>}]} {
    %c0 = arith.constant 0 : index
    %c0_0 = arith.constant 0 : index
    %0 = vector.load %arg1[%c0, %c0_0] : memref<2x1024xbf16, #tpu.memory_space<vmem>>, vector<2x1024xbf16>
    %c0_1 = arith.constant 0 : index
    %c0_2 = arith.constant 0 : index
    %1 = vector.load %arg2[%c0_1, %c0_2] : memref<1024x32xbf16, #tpu.memory_space<vmem>>, vector<1024x32xbf16>
    %cst = arith.constant dense<0.000000e+00> : vector<2x32xf32>
    %2 = tpu.matmul %0, %1, %cst {dimension_numbers = #tpu.dot_dimension_numbers<[1], [0], [0], [1], [0, 0, 1, 1], [], []>} : vector<2x1024xbf16>, vector<1024x32xbf16>, vector<2x32xf32> -> vector<2x32xf32>
    %3 = math.tanh %2 : vector<2x32xf32>
    %4 = arith.truncf %3 : vector<2x32xf32> to vector<2x32xbf16>
    %c0_3 = arith.constant 0 : index
    %c0_4 = arith.constant 0 : index
    %5 = vector.load %arg3[%c0_3, %c0_4] : memref<32x32xbf16, #tpu.memory_space<vmem>>, vector<32x32xbf16>
    %cst_5 = arith.constant dense<0.000000e+00> : vector<2x32xf32>
    %6 = tpu.matmul %4, %5, %cst_5 {dimension_numbers = #tpu.dot_dimension_numbers<[1], [0], [0], [1], [0, 0, 1, 1], [], []>} : vector<2x32xbf16>, vector<32x32xbf16>, vector<2x32xf32> -> vector<2x32xf32>
    %7 = math.tanh %6 : vector<2x32xf32>
    %8 = arith.truncf %7 : vector<2x32xf32> to vector<2x32xbf16>
    %c0_6 = arith.constant 0 : index
    %c0_7 = arith.constant 0 : index
    %9 = vector.load %arg4[%c0_6, %c0_7] : memref<32x16xbf16, #tpu.memory_space<vmem>>, vector<32x16xbf16>
    %cst_8 = arith.constant dense<0.000000e+00> : vector<2x16xf32>
    %10 = tpu.matmul %8, %9, %cst_8 {dimension_numbers = #tpu.dot_dimension_numbers<[1], [0], [0], [1], [0, 0, 1, 1], [], []>} : vector<2x32xbf16>, vector<32x16xbf16>, vector<2x16xf32> -> vector<2x16xf32>
    %11 = math.tanh %10 : vector<2x16xf32>
    %c0_9 = arith.constant 0 : index
    %c0_10 = arith.constant 0 : index
    %12 = vector.load %arg5[%c0_9, %c0_10] : memref<2x16xf32, #tpu.memory_space<vmem>>, vector<2x16xf32>
    tpu.vector_store %arg5[%c0_9, %c0_10], %11 {strides = array<i32>} : memref<2x16xf32, #tpu.memory_space<vmem>>, vector<2x16xf32>,
    return
  }
  func.func @transform_0(%arg0: i32) -> (i32, i32) {
    %c0_i32 = arith.constant 0 : i32
    %c0_i32_0 = arith.constant 0 : i32
    return %arg0, %c0_i32 : i32, i32
  }
  func.func @transform_1(%arg0: i32) -> (i32, i32) {
    %c0_i32 = arith.constant 0 : i32
    %c0_i32_0 = arith.constant 0 : i32
    %c0_i32_1 = arith.constant 0 : i32
    return %c0_i32, %c0_i32_0 : i32, i32
  }
  func.func @transform_2(%arg0: i32) -> (i32, i32) {
    %c0_i32 = arith.constant 0 : i32
    %c0_i32_0 = arith.constant 0 : i32
    %c0_i32_1 = arith.constant 0 : i32
    return %c0_i32, %c0_i32_0 : i32, i32
  }
  func.func @transform_3(%arg0: i32) -> (i32, i32) {
    %c0_i32 = arith.constant 0 : i32
    %c0_i32_0 = arith.constant 0 : i32
    %c0_i32_1 = arith.constant 0 : i32
    return %c0_i32, %c0_i32_0 : i32, i32
  }
  func.func @transform_4(%arg0: i32) -> (i32, i32) {
    %c0_i32 = arith.constant 0 : i32
    %c0_i32_0 = arith.constant 0 : i32
    return %arg0, %c0_i32 : i32, i32
  }
}

</mosaic_0001>

<bundles_post_ra>
// kernel: _lambda_.1
= control target key start
LH: loop header
LB: loop body
LE: loop exit
PB: predicated region body
PF: predicated region fallthrough
CT: control target
= control target key end

     0   :  { %v153_v28 = vlaneseq  ;;  %v1171_v36 = vmov 1966171168   ;;  %s1423_s0 = inlined_call_operand.vmem [shape: bf16[2,1024], index: 0, kind: input, shape index: {}]   ;;  %s1424_s1 = inlined_call_operand.vmem [shape: bf16[1024,32], index: 1, kind: input, shape index: {}]   ;;  %s1425_s2 = inlined_call_operand.vmem [shape: bf16[32,32], index: 2, kind: input, shape index: {}]   ;;  %s1426_s3 = inlined_call_operand.vmem [shape: bf16[32,16], index: 3, kind: input, shape index: {}]   ;;  %s1427_s4 = inlined_call_operand.hbm [shape: f32[2,16], index: 4, kind: output, shape index: {}]  }
   0x1   :  { %v1074_v0 = vld [vmem:[%s1424_s1 + $0x78] sm:$0xff]   ;;  %v1078_v4 = vld [vmem:[%s1424_s1 + $0x70] sm:$0xff]   ;;  %v1082_v8 = vld [vmem:[%s1424_s1 + $0x68] sm:$0xff]   ;;  %v151_v37 = vunpack.c.l.s4 %v1171_v36 }
   0x2   :  { %v1075_v1 = vld [vmem:[%s1424_s1 + $0xf8] sm:$0xff]   ;;  %960 = vmatprep.subr.bf16.mxu0 %v1074_v0  ;;  %v1079_v5 = vld [vmem:[%s1424_s1 + $0xf0] sm:$0xff]   ;;  %v1083_v9 = vld [vmem:[%s1424_s1 + $0xe8] sm:$0xff]   ;;  %v154_v33 = vshrl.u32 %v153_v28, 7 }
   0x3   :  { %v1076_v2 = vld [vmem:[%s1424_s1 + $0x38] sm:$0xff]   ;;  %982 = vmatprep.subr.bf16.mxu1 %v1075_v1  ;;  %v1080_v6 = vld [vmem:[%s1424_s1 + $0x30] sm:$0xff]   ;;  %v1084_v10 = vld [vmem:[%s1424_s1 + $0x28] sm:$0xff]   ;;  %v152_v40 = vunpack.c.0.s8 %v151_v37 }
   0x4   :  { %v1077_v3 = vld [vmem:[%s1424_s1 + $0xb8] sm:$0xff]   ;;  %961 = vmatpush3.bf16.msra.mxu0 %v1076_v2  ;;  %v1081_v7 = vld [vmem:[%s1424_s1 + $0xb0] sm:$0xff]   ;;  %v1085_v11 = vld [vmem:[%s1424_s1 + $0xa8] sm:$0xff]  }
   0x5   :  { %983 = vmatpush3.bf16.msra.mxu1 %v1077_v3  ;;  %962 = vmatprep.subr.bf16.mxu0 %v1078_v4  ;;  %v1086_v12 = vld [vmem:[%s1424_s1 + $0x60] sm:$0xff]   ;;  %v1090_v16 = vld [vmem:[%s1424_s1 + $0x58] sm:$0xff]   ;;  %v1094_v20 = vld [vmem:[%s1424_s1 + $0x50] sm:$0xff]   ;;  %v1305_v41 = vsub.s32 %v152_v40, %v154_v33 }
   0x6   :  { %984 = vmatprep.subr.bf16.mxu1 %v1079_v5  ;;  %v1087_v13 = vld [vmem:[%s1424_s1 + $0xe0] sm:$0xff]   ;;  %v1091_v17 = vld [vmem:[%s1424_s1 + $0xd8] sm:$0xff]   ;;  %v1095_v21 = vld [vmem:[%s1424_s1 + $0xd0] sm:$0xff]  }
   0x7   :  { %v1088_v14 = vld [vmem:[%s1424_s1 + $0x20] sm:$0xff]   ;;  %v1092_v18 = vld [vmem:[%s1424_s1 + $0x18] sm:$0xff]   ;;  %v1096_v22 = vld [vmem:[%s1424_s1 + $0x10] sm:$0xff]  }
   0x8   :  { %963 = vmatpush3.bf16.msra.mxu0 %v1080_v6  ;;  %v1089_v15 = vld [vmem:[%s1424_s1 + $0xa0] sm:$0xff]   ;;  %v1093_v19 = vld [vmem:[%s1424_s1 + $0x98] sm:$0xff]   ;;  %v1097_v23 = vld [vmem:[%s1424_s1 + $0x90] sm:$0xff]  }
   0x9   :  { %985 = vmatpush3.bf16.msra.mxu1 %v1081_v7  ;;  %964 = vmatprep.subr.bf16.mxu0 %v1082_v8  ;;  %v1098_v24 = vld [vmem:[%s1424_s1 + $0x48] sm:$0xff]   ;;  %v1102_v29 = vld [vmem:[%s1424_s1 + $0x40] sm:$0xff]   ;;  %v1107_v35 = vld [vmem:[%s1424_s1 + $0x178] sm:$0xff]  }
   0xa   :  { %986 = vmatprep.subr.bf16.mxu1 %v1083_v9  ;;  %v1099_v25 = vld [vmem:[%s1424_s1 + $0xc8] sm:$0xff]   ;;  %v1103_v30 = vld [vmem:[%s1424_s1 + $0xc0] sm:$0xff]   ;;  %v1108_v38 = vld [vmem:[%s1424_s1 + $0x1f8] sm:$0xff]  }
   0xb   :  { %v1100_v26 = vld [vmem:[%s1424_s1 + $0x8] sm:$0xff]   ;;  %v1104_v31 = vld [vmem:[%s1424_s1] sm:$0xff]   ;;  %v1109_v47 = vld [vmem:[%s1424_s1 + $0x138] sm:$0xff]  }
   0xc   :  { %965 = vmatpush3.bf16.msra.mxu0 %v1084_v10  ;;  %v1101_v27 = vld [vmem:[%s1424_s1 + $0x88] sm:$0xff]   ;;  %v1105_v32 = vld [vmem:[%s1424_s1 + $0x80] sm:$0xff]   ;;  %v1110_v49 = vld [vmem:[%s1424_s1 + $0x1b8] sm:$0xff]  }
   0xd   :  { %987 = vmatpush3.bf16.msra.mxu1 %v1085_v11  ;;  %966 = vmatprep.subr.bf16.mxu0 %v1086_v12  ;;  %v19_v34 = vld [vmem:[%s1423_s0] sm:$0xff]  ;;  %v1111_v52 = vld [vmem:[%s1424_s1 + $0x170] sm:$0xff]   ;;  %v1115_v58 = vld [vmem:[%s1424_s1 + $0x168] sm:$0xff]  }
   0xe   :  { %988 = vmatprep.subr.bf16.mxu1 %v1087_v13  ;;  %v149_v39 = vcombine.high %v19_v34, %v19_v34  ;;  %v156_v42 = vrot.slane %v19_v34, %v1305_v41  ;;  %v1112_v54 = vld [vmem:[%s1424_s1 + $0x1f0] sm:$0xff]   ;;  %v1116_v59 = vld [vmem:[%s1424_s1 + $0x1e8] sm:$0xff]   ;;  %v1119_v62 = vld [vmem:[%s1424_s1 + $0x160] sm:$0xff]  }
   0xf   :  { %v1113_v55 = vld [vmem:[%s1424_s1 + $0x130] sm:$0xff]   ;;  %v1117_v60 = vld [vmem:[%s1424_s1 + $0x128] sm:$0xff]   ;;  %v1120_v63 = vld [vmem:[%s1424_s1 + $0x1e0] sm:$0xff]  }
  0x10   :  { %967 = vmatpush3.bf16.msra.mxu0 %v1088_v14  ;;  %v1309_v43 = vrot.slane %v149_v39, %v1305_v41  ;;  %v164_v44 = vcombine.high %v156_v42, %v156_v42  ;;  %v172_v45 = vrot.slane %v156_v42, %v1305_v41  ;;  %v1114_v57 = vld [vmem:[%s1424_s1 + $0x1b0] sm:$0xff]   ;;  %v1118_v61 = vld [vmem:[%s1424_s1 + $0x1a8] sm:$0xff]   ;;  %v1121_v0 = vld [vmem:[%s1424_s1 + $0x120] sm:$0xff]  }
  0x11   :  { %989 = vmatpush3.bf16.msra.mxu1 %v1089_v15  ;;  %968 = vmatprep.subr.bf16.mxu0 %v1090_v16  ;;  %v1122_v1 = vld [vmem:[%s1424_s1 + $0x1a0] sm:$0xff]   ;;  %v1123_v2 = vld [vmem:[%s1424_s1 + $0x158] sm:$0xff]   ;;  %v1127_v6 = vld [vmem:[%s1424_s1 + $0x150] sm:$0xff]  }
  0x12   :  { %990 = vmatprep.subr.bf16.mxu1 %v1091_v17  ;;  %v165_v46 = vcombine.high %v1309_v43, %v1309_v43  ;;  %v186_v48 = vrot.slane %v164_v44, %v1305_v41  ;;  %v194_v51 = vcombine.high %v172_v45, %v172_v45  ;;  %v1124_v3 = vld [vmem:[%s1424_s1 + $0x1d8] sm:$0xff]   ;;  %v1128_v7 = vld [vmem:[%s1424_s1 + $0x1d0] sm:$0xff]   ;;  %v1131_v10 = vld [vmem:[%s1424_s1 + $0x148] sm:$0xff]  }
  0x13   :  { %v1125_v4 = vld [vmem:[%s1424_s1 + $0x118] sm:$0xff]   ;;  %v1129_v8 = vld [vmem:[%s1424_s1 + $0x110] sm:$0xff]   ;;  %v1132_v11 = vld [vmem:[%s1424_s1 + $0x1c8] sm:$0xff]  }
  0x14   :  { %969 = vmatpush3.bf16.msra.mxu0 %v1092_v18  ;;  %v193_v50 = vrot.slane %v165_v46, %v1305_v41  ;;  %622 = vmatprep.mubr.bf16.mxu0 %v186_v48  ;;  %v196_v53 = vcombine.high %v186_v48, %v186_v48  ;;  %v1126_v5 = vld [vmem:[%s1424_s1 + $0x198] sm:$0xff]   ;;  %v1130_v9 = vld [vmem:[%s1424_s1 + $0x190] sm:$0xff]   ;;  %v1133_v12 = vld [vmem:[%s1424_s1 + $0x108] sm:$0xff]  }
  0x15   :  { %991 = vmatpush3.bf16.msra.mxu1 %v1093_v19  ;;  %970 = vmatprep.subr.bf16.mxu0 %v1094_v20 }
  0x16   :  { %992 = vmatprep.subr.bf16.mxu1 %v1095_v21  ;;  %v197_v56 = vcombine.high %v193_v50, %v193_v50  ;;  %662 = vmatprep.mubr.bf16.mxu1 %v196_v53 }
  0x18   :  { %971 = vmatpush3.bf16.msra.mxu0 %v1096_v22 }
  0x19   :  { %993 = vmatpush3.bf16.msra.mxu1 %v1097_v23  ;;  %972 = vmatprep.subr.bf16.mxu0 %v1098_v24 }
  0x1a   :  { %994 = vmatprep.subr.bf16.mxu1 %v1099_v25 }
  0x1c   :  { %973 = vmatpush3.bf16.msra.mxu0 %v1100_v26 }
  0x1d   :  { %995 = vmatpush3.bf16.msra.mxu1 %v1101_v27  ;;  %974 = vmatprep.subr.bf16.mxu0 %v1102_v29 }
  0x1e   :  { %996 = vmatprep.subr.bf16.mxu1 %v1103_v30 }
  0x20   :  { %975 = vmatpush3.bf16.msra.mxu0 %v1104_v31 }
  0x21   :  { %997 = vmatpush3.bf16.msra.mxu1 %v1105_v32  ;;  %1004 = vmatprep.subr.bf16.mxu0 %v1107_v35 }
  0x22   :  { %1026 = vmatprep.subr.bf16.mxu1 %v1108_v38 }
  0x23   :  { %623 = vmatmul.mubr.bf16.vlgmr.msra.gmra.mxu0 %v172_v45 }
  0x24   :  { %1005 = vmatpush3.bf16.msra.mxu0 %v1109_v47  ;;  %663 = vmatmul.mubr.bf16.vlgmr.msra.gmra.mxu1 %v194_v51 }
  0x25   :  { %1006 = vmatprep.subr.bf16.mxu0 %v1111_v52  ;;  %1027 = vmatpush3.bf16.msra.mxu1 %v1110_v49 }
  0x26   :  { %702 = vmatprep.mubr.bf16.mxu0 %v193_v50  ;;  %1028 = vmatprep.subr.bf16.mxu1 %v1112_v54 }
  0x27   :  { %742 = vmatprep.mubr.bf16.mxu1 %v197_v56 }
  0x28   :  { %1007 = vmatpush3.bf16.msra.mxu0 %v1113_v55 }
  0x29   :  { %1008 = vmatprep.subr.bf16.mxu0 %v1115_v58  ;;  %1029 = vmatpush3.bf16.msra.mxu1 %v1114_v57 }
  0x2a   :  { %1030 = vmatprep.subr.bf16.mxu1 %v1116_v59 }
  0x2c   :  { %1009 = vmatpush3.bf16.msra.mxu0 %v1117_v60 }
  0x2d   :  { %1010 = vmatprep.subr.bf16.mxu0 %v1119_v62  ;;  %1031 = vmatpush3.bf16.msra.mxu1 %v1118_v61 }
  0x2e   :  { %1032 = vmatprep.subr.bf16.mxu1 %v1120_v63 }
  0x30   :  { %1011 = vmatpush3.bf16.msra.mxu0 %v1121_v0 }
  0x31   :  { %1012 = vmatprep.subr.bf16.mxu0 %v1123_v2  ;;  %1033 = vmatpush3.bf16.msra.mxu1 %v1122_v1 }
  0x32   :  { %1034 = vmatprep.subr.bf16.mxu1 %v1124_v3 }
  0x34   :  { %1013 = vmatpush3.bf16.msra.mxu0 %v1125_v4 }
  0x35   :  { %1014 = vmatprep.subr.bf16.mxu0 %v1127_v6  ;;  %1035 = vmatpush3.bf16.msra.mxu1 %v1126_v5 }
  0x36   :  { %1036 = vmatprep.subr.bf16.mxu1 %v1128_v7 }
  0x38   :  { %1015 = vmatpush3.bf16.msra.mxu0 %v1129_v8 }
  0x39   :  { %9 = vsyncpa [#allocation3], 0  ;;  %1016 = vmatprep.subr.bf16.mxu0 %v1131_v10  ;;  %v1135_v13 = vld [vmem:[%s1424_s1 + $0x140] sm:$0xff]   ;;  %1037 = vmatpush3.bf16.msra.mxu1 %v1130_v9  ;;  %v1134_v14 = vld [vmem:[%s1424_s1 + $0x188] sm:$0xff]   ;;  %v179_v17 = vrot.slane %v1309_v43, %v1305_v41  ;;  %v1172_v21 = vmov 0.0   ;;  %vm1173_vm0 = vmmov 0  }
  0x3a   :  { %1038 = vmatprep.subr.bf16.mxu1 %v1132_v11  ;;  %v1136_v15 = vld [vmem:[%s1424_s1 + $0x1c0] sm:$0xff]   ;;  %v1139_v20 = vld [vmem:[%s1425_s2 + $0x8] sm:$0xff]   ;;  %vm768_vm1 = vcmask 261120   ;;  %s1174_s18 = smov [#allocation2]   ;;  %vm874_vm2 = vcmask 123904  }
  0x3b   :  { %v1137_v16 = vld [vmem:[%s1424_s1 + $0x100] sm:$0xff]   ;;  %v195_v19 = vcombine.high %v179_v17, %v179_v17  ;;  %v1141_v48 = vld [vmem:[%s1426_s3 + $0x8] sm:$0xff]   ;;  %s882_s19 = sshll.u32 %s1174_s18, 4  ;;  %s883_s19 = int_to_ptr.vmem [resolvable:$true] %s882_s19 }
  0x3c   :  { %1017 = vmatpush3.bf16.msra.mxu0 %v1133_v12  ;;  %v1138_v18 = vld [vmem:[%s1424_s1 + $0x180] sm:$0xff]   ;;  %p1154_p1 = scmp.lt.s32.totalorder %s883_s19, %s883_s19 }
  0x3d   :  { %1018 = vmatprep.subr.bf16.mxu0 %v1135_v13  ;;  %1039 = vmatpush3.bf16.msra.mxu1 %v1134_v14  ;;  %v1140_v22 = vld [vmem:[%s1425_s2] sm:$0xff]  }
  0x3e   :  { %1040 = vmatprep.subr.bf16.mxu1 %v1136_v15  ;;  %v1142_v49 = vld [vmem:[%s1426_s3] sm:$0xff]   ;;  %s1149_s3 = scalar_lea.vmem %s883_s19, 32 }
  0x3f   :  { %p1150_p0 = scmp.ne.s32.totalorder %s883_s19, %s1149_s3  ;;  %p1155_p2 = scmp.lt.s32.totalorder %s1149_s3, %s1149_s3 }
  0x40   :  { %1019 = vmatpush3.bf16.msra.mxu0 %v1137_v16 }
  0x41   :  { %1041 = vmatpush3.bf16.msra.mxu1 %v1138_v18  ;;  %1054 = vmatprep.subr.bf16.mxu0 %v1172_v21  ;;  %p1156_p3 = por %p1155_p2, %p1154_p1 }
  0x42   :  { %1062 = vmatprep.subr.bf16.mxu1 %v1172_v21 }
  0x43   :  { %703 = vmatmul.mubr.bf16.vlgmr.msra.gmra.mxu0 %v179_v17  ;;  %p1157_p4 = pnand %p1156_p3, %p1150_p0 }
  0x44   :  { %743 = vmatmul.mubr.bf16.vlgmr.msra.gmra.mxu1 %v195_v19  ;;  %1055 = vmatpush3.bf16.msra.mxu0 %v1139_v20 }
  0x45   :  { %1056 = vmatprep.subr.bf16.mxu0 %v1172_v21  ;;  %1058 = vmatprep.mubr.msk.bf16.mxu0 %vm1173_vm0, %v1172_v21 }
  0x46   :  { %1066 = vmatprep.mubr.msk.bf16.mxu1 %vm1173_vm0, %v1172_v21  ;;  %1063 = vmatpush3.bf16.msra.mxu1 %v1141_v48 }
  0x47   :  { %1064 = vmatprep.subr.bf16.mxu1 %v1172_v21 }
  0x48   :  { %1057 = vmatpush3.bf16.msra.mxu0 %v1140_v22 }
  0x4a   :  { %1065 = vmatpush3.bf16.msra.mxu1 %v1142_v49 }
  0xe3   :  { %v976_v23 = vpop.f32.mrf.mxu0 }
  0xe4   :  { %v998_v24 = vpop.f32.mrf.mxu1 }
  0xe5   :  { %v977_v25 = vpop.f32.mrf.mxu0 }
  0xe6   :  { %v999_v26 = vpop.f32.mrf.mxu1  ;;  %v978_v31 = vadd.f32 %v977_v25, %v976_v23 }
  0xe7   :  { %v979_v27 = vpop.f32.mrf.mxu0  ;;  %v1000_v32 = vadd.f32 %v999_v26, %v998_v24 }
  0xe8   :  { %v1001_v28 = vpop.f32.mrf.mxu1 }
  0xe9   :  { %v980_v29 = vpop.f32.mrf.mxu0  ;;  %v665_v36 = vadd.f32 %v1000_v32, %v978_v31 }
  0xea   :  { %v1002_v30 = vpop.f32.mrf.mxu1 }
 0x103   :  { %v1020_v33 = vpop.f32.mrf.mxu0 }
 0x104   :  { %v1042_v34 = vpop.f32.mrf.mxu1 }
 0x105   :  { %v1021_v35 = vpop.f32.mrf.mxu0 }
 0x106   :  { %v1022_v37 = vadd.f32 %v1021_v35, %v1020_v33  ;;  %v1043_v38 = vpop.f32.mrf.mxu1 }
 0x107   :  { %v1023_v39 = vpop.f32.mrf.mxu0  ;;  %v1044_v41 = vadd.f32 %v1043_v38, %v1042_v34 }
 0x108   :  { %v705_v40 = vadd.f32 %v1022_v37, %v665_v36  ;;  %v1045_v42 = vpop.f32.mrf.mxu1 }
 0x109   :  { %v1024_v43 = vpop.f32.mrf.mxu0 }
 0x10a   :  { %v745_v44 = vadd.f32 %v1044_v41, %v705_v40  ;;  %v1046_v45 = vpop.f32.mrf.mxu1 }
 0x10c   :  { %1143 = vtanh.f32 %v745_v44 }
 0x119   :  { %v1144_v46 = vpop.eup %1143 }
 0x11a   :  { %v751_v47 = vpack.c.bf16 %v1144_v46, %v1144_v46 }
 0x11c   :  { %1059 = vmatmul.mubr.msk.bf16.vlgmr.msra.gmra.mxu0 %vm768_vm1, %v751_v47 }
 0x1dc   :  { %v806_v50 = vpop.f32.mrf.mxu0 }
 0x1dd   :  { %1145 = vtanh.f32 %v806_v50 }
 0x1de   :  { %v1060_v51 = vpop.f32.mrf.mxu0 }
 0x1e0   :  { %v809_v52 = vpop.f32.mrf.mxu0 }
 0x1e2   :  { %v1061_v53 = vpop.f32.mrf.mxu0 }
 0x1ea   :  { %v1146_v54 = vpop.eup %1145 }
 0x1eb   :  { %v813_v55 = vpack.c.bf16 %v1146_v54, %v1146_v54 }
 0x1ed   :  { %1067 = vmatmul.mubr.msk.bf16.vlgmr.msra.gmra.mxu1 %vm768_vm1, %v813_v55 }
 0x2ad   :  { %v867_v56 = vpop.f32.mrf.mxu1 }
 0x2ae   :  { %1147 = vtanh.f32 %v867_v56 }
 0x2af   :  { %v1068_v57 = vpop.f32.mrf.mxu1 }
 0x2b1   :  { %v870_v58 = vpop.f32.mrf.mxu1 }
 0x2b3   :  { %v1069_v59 = vpop.f32.mrf.mxu1 }
 0x2bb   :  { %v1148_v60 = vpop.eup %1147 }
 0x2bc   :  { %875 = vst.msk [vmem:[#allocation2] sm:$0x3] %vm874_vm2, %v1148_v60 }
 0x2bd   :  { %1160 = shalt.err (!%p1157_p4)
}
 0x2be   :  { %885 = dma.vmem_to_hbm [thread:$0]  %s883_s19, 32, %s1427_s4, [#allocation3]  }
 0x2bf   :  { %1169 = dma.done.wait [#allocation3], 32  }
 0x2c0   :  { %1170 = vsyncadd [#allocation3], 4294967264 }
 0x2c1   :  { %889 = vsyncpa [#allocation3], 1 }

</bundles_post_ra>
